<compile_context>
chip_gen: v7x
topology: tpu7x:2x2x1
jax: 0.10.0
libtpu: 0.0.40
codegen_flags: <defaults>
</compile_context>

<pallas_src>
import functools

import numpy as np
import jax
import jax.numpy as jnp
from jax.experimental import pallas as pl
from jax.experimental.pallas import tpu as pltpu


# --------------------------------------------------------------------------
# Fused matmul (+bias, +ReLU) kernel -- used for conv (im2col) and resize
# --------------------------------------------------------------------------

def _round_up(v, m):
    return ((v + m - 1) // m) * m


def _matmul_bias_kernel(a_ref, w_ref, b_ref, o_ref, *, relu):
    # a: (tm, Kp), w: (Kp, Np), b: (1, Np) f32 -> o: (tm, Np) out_dtype
    acc = jnp.dot(a_ref[...], w_ref[...], preferred_element_type=jnp.float32)
    acc = acc + b_ref[...]
    if relu:
        acc = jnp.maximum(acc, 0.0)
    o_ref[...] = acc.astype(o_ref.dtype)


@functools.lru_cache(maxsize=None)
def _matmul_program(Mp, Kp, Np, tm, relu, out_dtype):
    f = pl.pallas_call(
        functools.partial(_matmul_bias_kernel, relu=relu),
        out_shape=jax.ShapeDtypeStruct((Mp, Np), out_dtype),
        grid=(Mp // tm,),
        in_specs=[
            pl.BlockSpec((tm, Kp), lambda i: (i, 0)),
            pl.BlockSpec((Kp, Np), lambda i: (0, 0)),
            pl.BlockSpec((1, Np), lambda i: (0, 0)),
        ],
        out_specs=pl.BlockSpec((tm, Np), lambda i: (i, 0)),
        compiler_params=pltpu.CompilerParams(
            dimension_semantics=("parallel",),
            vmem_limit_bytes=32 * 1024 * 1024),
    )
    return jax.jit(f)


def _choose_tm(M):
    # Single program when M is small (avoid a serial grid loop on 1-TC chips),
    # 2 programs for medium M (keeps both v7x TensorCores busy), 1024 cap.
    M16 = _round_up(max(M, 16), 16)
    if M16 <= 768:
        return M16
    if M16 <= 2048:
        return _round_up((M16 + 1) // 2, 16)
    return 1024


def _pad_k(K):
    # Lane-dense K loads: 128-aligned once K is large, 16-aligned (bf16
    # sublane packing of the W block) when K is small.
    return _round_up(K, 128) if K >= 256 else _round_up(K, 16)


def matmul_bias(a, w, bias=None, relu=False,
                out_dtype=jnp.float32, compute_dtype=jnp.bfloat16):
    """(M,K) @ (K,N) + bias with fused ReLU.  MXU operands in compute_dtype,
    f32 accumulation, lane-dense (128-padded) output columns."""
    M, K = a.shape
    N = w.shape[1]
    Kp = _pad_k(K)
    Np = _round_up(N, 128)
    tm = _choose_tm(M)
    Mp = _round_up(M, tm)

    a_c = a.astype(compute_dtype)
    if (Mp, Kp) != (M, K):
        a_c = jnp.pad(a_c, ((0, Mp - M), (0, Kp - K)))
    w_c = w.astype(compute_dtype)
    if (Kp, Np) != (K, N):
        w_c = jnp.pad(w_c, ((0, Kp - K), (0, Np - N)))
    b = jnp.zeros((N,), jnp.float32) if bias is None else bias.astype(jnp.float32)
    if Np != N:
        b = jnp.pad(b, (0, Np - N))

    out = _matmul_program(Mp, Kp, Np, tm, bool(relu), out_dtype)(
        a_c, w_c, b.reshape(1, Np))
    if (Mp, Np) != (M, N):
        out = out[:M, :N]
    return out


# --------------------------------------------------------------------------
# Correlation kernel: mask * support, L2-normalize, bmm, ReLU (all fused).
# One call per pyramid level; the grid runs over feature x shot x batch so the
# per-level launch count is 1 instead of nfeat*3*shot.
# --------------------------------------------------------------------------

def _corr_kernel(q_ref, s_ref, m_ref, o_ref):
    q = q_ref[0].astype(jnp.float32)                     # (Lq, C)
    s = s_ref[0].astype(jnp.float32) * m_ref[0]          # (Ls, C) * (Ls, 1)
    eps = 1e-5
    q_inv = jax.lax.rsqrt(jnp.sum(q * q, axis=1, keepdims=True) + eps * eps)
    s_inv = jax.lax.rsqrt(jnp.sum(s * s, axis=1, keepdims=True) + eps * eps)
    qn = (q * q_inv).astype(jnp.bfloat16)
    sn = (s * s_inv).astype(jnp.bfloat16)
    corr = jax.lax.dot_general(qn, sn, (((1,), (1,)), ((), ())),
                               preferred_element_type=jnp.float32)
    o_ref[0] = jnp.maximum(corr, 0.0).astype(o_ref.dtype)   # clamp(min=0)


@functools.lru_cache(maxsize=None)
def _corr_program(F3, SHOT, B, Lq, Ls, C, out_dtype):
    f = pl.pallas_call(
        _corr_kernel,
        out_shape=jax.ShapeDtypeStruct((F3 * SHOT * B, Lq, Ls), out_dtype),
        grid=(F3, SHOT, B),
        in_specs=[
            # query block reused across the shot axis (no HBM duplication)
            pl.BlockSpec((1, Lq, C), lambda p, i, b: (p * B + b, 0, 0)),
            pl.BlockSpec((1, Ls, C), lambda p, i, b: ((p * SHOT + i) * B + b, 0, 0)),
            # the same support mask serves every feature / modality
            pl.BlockSpec((1, Ls, 1), lambda p, i, b: (i * B + b, 0, 0)),
        ],
        out_specs=pl.BlockSpec(
            (1, Lq, Ls), lambda p, i, b: ((p * SHOT + i) * B + b, 0, 0)),
        compiler_params=pltpu.CompilerParams(
            dimension_semantics=("parallel", "parallel", "parallel")),
    )
    return jax.jit(f)


def correlation(q, s, mask, shot, batch, out_dtype=jnp.bfloat16):
    """q:(F3*B,Lq,C), s:(F3*shot*B,Ls,C), mask:(shot*B,Ls,1) ->
    relu(cosine corr): (F3*shot*B, Lq, Ls)."""
    F3 = q.shape[0] // batch
    Lq, C = q.shape[1], q.shape[2]
    Ls = s.shape[1]
    return _corr_program(F3, shot, batch, Lq, Ls, C, out_dtype)(q, s, mask)


# --------------------------------------------------------------------------
# GroupNorm + ReLU kernel (f32 statistics, bf16 I/O)
# --------------------------------------------------------------------------

def _gn_relu_kernel(x_ref, w_ref, b_ref, o_ref, *, eps, inv_count):
    x = x_ref[0].astype(jnp.float32)               # (G, cpg, L)
    s = jnp.sum(x, axis=2, keepdims=True)          # lane reduce
    s = jnp.sum(s, axis=1, keepdims=True)          # sublane reduce -> (G,1,1)
    mean = s * inv_count
    d = x - mean
    v = jnp.sum(d * d, axis=2, keepdims=True)
    v = jnp.sum(v, axis=1, keepdims=True)
    inv_std = jax.lax.rsqrt(v * inv_count + eps)
    y = d * inv_std * w_ref[...] + b_ref[...]      # per-channel affine
    o_ref[0] = jnp.maximum(y, 0.0).astype(o_ref.dtype)


@functools.lru_cache(maxsize=None)
def _gn_program(N, G, cpg, L, out_dtype):
    inv_count = 1.0 / float(cpg * L)
    f = pl.pallas_call(
        functools.partial(_gn_relu_kernel, eps=1e-5, inv_count=inv_count),
        out_shape=jax.ShapeDtypeStruct((N, G, cpg, L), out_dtype),
        grid=(N,),
        in_specs=[
            pl.BlockSpec((1, G, cpg, L), lambda n: (n, 0, 0, 0)),
            pl.BlockSpec((G, cpg, 1), lambda n: (0, 0, 0)),
            pl.BlockSpec((G, cpg, 1), lambda n: (0, 0, 0)),
        ],
        out_specs=pl.BlockSpec((1, G, cpg, L), lambda n: (n, 0, 0, 0)),
        compiler_params=pltpu.CompilerParams(dimension_semantics=("parallel",)),
    )
    return jax.jit(f)


def group_norm_relu(x, weight, bias, groups=4, out_dtype=jnp.bfloat16):
    """x: (N, C, L) -> GroupNorm(groups) + affine + ReLU."""
    N, C, L = x.shape
    cpg = C // groups
    out = _gn_program(N, groups, cpg, L, out_dtype)(
        x.reshape(N, groups, cpg, L),
        weight.reshape(groups, cpg, 1).astype(jnp.float32),
        bias.reshape(groups, cpg, 1).astype(jnp.float32))
    return out.reshape(N, C, L)


# --------------------------------------------------------------------------
# Bilinear resize (align_corners=True), SEPARABLE: W matmul then H matmul.
# --------------------------------------------------------------------------

def _interp_matrix_np(out_size, in_size):
    if out_size == 1 or in_size == 1:
        src = np.zeros((out_size,), dtype=np.float64)
    else:
        src = np.arange(out_size, dtype=np.float64) * (in_size - 1) / (out_size - 1)
    lo = np.minimum(np.floor(src).astype(np.int64), in_size - 1)
    hi = np.minimum(lo + 1, in_size - 1)
    w_hi = src - lo
    w_lo = 1.0 - w_hi
    m = np.zeros((out_size, in_size), dtype=np.float64)
    m[np.arange(out_size), lo] += w_lo
    m[np.arange(out_size), hi] += w_hi
    return m


@functools.lru_cache(maxsize=None)
def _interp_matrix(out_size, in_size):
    # (in, out) so it can sit on the RHS of a matmul
    return jnp.asarray(_interp_matrix_np(out_size, in_size).T, dtype=jnp.float32)


def bilinear_resize_2d(x, out_hw):
    """x: (B', Hi, Wi) -> (B', Ho, Wo), bilinear align_corners=True.
    Two small separable matmuls; f32 path when the input is f32."""
    Bf, Hi, Wi = x.shape
    Ho, Wo = out_hw
    if (Ho, Wo) == (Hi, Wi):
        return x
    cdt = jnp.float32 if x.dtype == jnp.float32 else jnp.bfloat16
    odt = x.dtype
    y = x
    if Wo != Wi:
        y = matmul_bias(y.reshape(Bf * Hi, Wi), _interp_matrix(Wo, Wi),
                        out_dtype=odt, compute_dtype=cdt).reshape(Bf, Hi, Wo)
    if Ho != Hi:
        y = y.transpose(0, 2, 1).reshape(Bf * Wo, Hi)
        y = matmul_bias(y, _interp_matrix(Ho, Hi),
                        out_dtype=odt, compute_dtype=cdt)
        y = y.reshape(Bf, Wo, Ho).transpose(0, 2, 1)
    return y


def interpolate_nchw(x, out_hw):
    B, C, H, W = x.shape
    y = bilinear_resize_2d(x.reshape(B * C, H, W), out_hw)
    return y.reshape(B, C, out_hw[0], out_hw[1])


def interpolate_nhwc(x, out_hw):
    B, H, W, C = x.shape
    y = bilinear_resize_2d(x.transpose(0, 3, 1, 2).reshape(B * C, H, W), out_hw)
    return y.reshape(B, C, out_hw[0], out_hw[1]).transpose(0, 2, 3, 1)


# --------------------------------------------------------------------------
# Conv2d (NHWC) via bf16 im2col glue + Pallas matmul
# --------------------------------------------------------------------------

def _im2col_nhwc(x, kh, kw, stride, pad):
    # TODO(synk): fuse the kh*kw tap gather into the matmul K grid axis instead
    # of materializing the patches (bf16) in HBM.
    N, H, W, C = x.shape
    sh, sw = stride
    ph, pw = pad
    xp = jnp.pad(x.astype(jnp.bfloat16), ((0, 0), (ph, ph), (pw, pw), (0, 0)))
    Ho = (H + 2 * ph - kh) // sh + 1
    Wo = (W + 2 * pw - kw) // sw + 1
    cols = []
    for i in range(kh):
        for j in range(kw):
            cols.append(xp[:, i:i + sh * (Ho - 1) + 1:sh,
                           j:j + sw * (Wo - 1) + 1:sw, :])
    patches = jnp.stack(cols, axis=3)              # (N,Ho,Wo,kh*kw,C)
    return patches.reshape(N * Ho * Wo, kh * kw * C), Ho, Wo


def conv2d_nhwc(x, w, b, stride=(1, 1), pad=(0, 0), relu=False,
                out_dtype=jnp.float32):
    """x: (N,H,W,Cin), w: PyTorch OIHW (Cout,Cin,kh,kw) -> (N,Ho,Wo,Cout)."""
    N, H, W, Cin = x.shape
    Cout, _, kh, kw = w.shape
    if kh == 1 and kw == 1 and stride == (1, 1) and pad == (0, 0):
        patches = x.reshape(N * H * W, Cin)
        Ho, Wo = H, W
    else:
        patches, Ho, Wo = _im2col_nhwc(x, kh, kw, stride, pad)
    wm = w.transpose(2, 3, 1, 0).reshape(kh * kw * Cin, Cout)   # (K, Cout)
    out = matmul_bias(patches, wm, b, relu=relu, out_dtype=out_dtype)
    return out.reshape(N, Ho, Wo, Cout)


# --------------------------------------------------------------------------
# Center-pivot 4D convolution, HPNLearner
# --------------------------------------------------------------------------

HPN_CFG = dict(                      # static (kernel, stride) per building block
    enc4=((3, 2), (3, 2), (3, 2)),
    enc3=((5, 4), (3, 2), (3, 2)),
    enc2=((5, 4), (5, 4), (3, 2)),
    enc43=((3, 1), (3, 1), (3, 1)),
    enc32=((3, 1), (3, 1), (3, 1)),
)


def center_pivot_conv4d(x, p, k, s):
    """x: (B, Cin, ha, wa, hb, wb)."""
    B, Cin, ha, wa, hb, wb = x.shape
    pad = k // 2
    Cout = p['w1'].shape[0]
    # path 1: conv over query dims at pruned support centers
    x1_in = x[:, :, :, :, ::s, ::s] if s > 1 else x
    phb, pwb = x1_in.shape[4], x1_in.shape[5]
    x1 = x1_in.transpose(0, 4, 5, 2, 3, 1).reshape(B * phb * pwb, ha, wa, Cin)
    o1 = conv2d_nhwc(x1, p['w1'], p['b1'], stride=(1, 1), pad=(pad, pad),
                     out_dtype=jnp.bfloat16)
    o1 = o1.reshape(B, phb, pwb, ha, wa, Cout).transpose(0, 5, 3, 4, 1, 2)
    # path 2: conv over support dims (strided)
    x2 = x.transpose(0, 2, 3, 4, 5, 1).reshape(B * ha * wa, hb, wb, Cin)
    o2 = conv2d_nhwc(x2, p['w2'], p['b2'], stride=(s, s), pad=(pad, pad),
                     out_dtype=jnp.bfloat16)
    ohb, owb = o2.shape[1], o2.shape[2]
    o2 = o2.reshape(B, ha, wa, ohb, owb, Cout).transpose(0, 5, 1, 2, 3, 4)
    return o1 + o2


def _apply_building_block(x, params, cfg):
    for p, (k, s) in zip(params, cfg):
        x = center_pivot_conv4d(x, p, k, s)
        B, C, ha, wa, hb, wb = x.shape
        x = group_norm_relu(x.reshape(B, C, ha * wa * hb * wb), p['gw'], p['gb'])
        x = x.reshape(B, C, ha, wa, hb, wb)
    return x


def interpolate_support_dims(hc, spatial_size):
    B, ch, ha, wa, hb, wb = hc.shape
    oh, ow = spatial_size
    x = hc.transpose(0, 1, 4, 5, 2, 3).reshape(B * ch * hb * wb, ha, wa)
    x = bilinear_resize_2d(x, (oh, ow))
    return x.reshape(B, ch, hb, wb, oh, ow).transpose(0, 1, 4, 5, 2, 3)


def hpn_learner(corr_pyramid, hp):
    sqz4 = _apply_building_block(corr_pyramid[0], hp['enc4'], HPN_CFG['enc4'])
    sqz3 = _apply_building_block(corr_pyramid[1], hp['enc3'], HPN_CFG['enc3'])
    sqz2 = _apply_building_block(corr_pyramid[2], hp['enc2'], HPN_CFG['enc2'])

    sqz4 = interpolate_support_dims(sqz4, sqz3.shape[-4:-2])
    mix43 = _apply_building_block(sqz4 + sqz3, hp['enc43'], HPN_CFG['enc43'])

    mix43 = interpolate_support_dims(mix43, sqz2.shape[-4:-2])
    mix432 = _apply_building_block(mix43 + sqz2, hp['enc32'], HPN_CFG['enc32'])

    B, ch, ha, wa, hb, wb = mix432.shape
    enc = jnp.mean(mix432.astype(jnp.float32).reshape(B, ch, ha, wa, hb * wb),
                   axis=-1)                                       # (B,ch,ha,wa)
    enc = enc.transpose(0, 2, 3, 1)                               # NHWC

    (w1, b1), (w2, b2) = hp['dec1']
    dec = conv2d_nhwc(enc, w1, b1, pad=(1, 1), relu=True, out_dtype=jnp.bfloat16)
    dec = conv2d_nhwc(dec, w2, b2, pad=(1, 1), relu=True, out_dtype=jnp.bfloat16)
    # Reference HSNet uses size(-1)*2 (=W) for both target dims (square maps).
    up = (dec.shape[2] * 2, dec.shape[2] * 2)
    dec = interpolate_nhwc(dec, up)
    (w3, b3), (w4, b4) = hp['dec2']
    dec = conv2d_nhwc(dec, w3, b3, pad=(1, 1), relu=True, out_dtype=jnp.bfloat16)
    dec = conv2d_nhwc(dec, w4, b4, pad=(1, 1), relu=False, out_dtype=jnp.bfloat16)
    return dec                                                    # NHWC


# --------------------------------------------------------------------------
# Synthetic backbone / mask pyramid / batched correlation pyramid
# --------------------------------------------------------------------------

STACK_IDS = (3, 9, 13)   # resnet50: bincount(lids).__reversed__().cumsum()[:3]

# TODO(synk): pretrained ResNet-50 backbone is not reproducible in-script; it is
# substituted with a deterministic synthetic multi-layer extractor (bilinear
# downsample + 1x1 conv + ReLU per feature id) preserving the 4/6/3 pyramid.
LAYER_SPECS = [  # (num_feats, channels, spatial)
    (4, 8, 8),    # "layer2"
    (6, 16, 4),   # "layer3"
    (3, 16, 2),   # "layer4"
]


def extract_feats(imgs, backbone_params):
    """imgs: (N,3,H,W) -> list of 13 NHWC bf16 features (N, sp, sp, ch)."""
    N, C, H, W = imgs.shape
    feats, idx = [], 0
    for nfeat, _, sp in LAYER_SPECS:
        img_s = bilinear_resize_2d(imgs.reshape(N * C, H, W), (sp, sp))
        img_s = img_s.reshape(N, C, sp, sp).transpose(0, 2, 3, 1)   # NHWC
        for _ in range(nfeat):
            w, b = backbone_params[idx]; idx += 1
            feats.append(conv2d_nhwc(img_s, w, b, pad=(0, 0), relu=True,
                                     out_dtype=jnp.bfloat16))
    return feats


def build_mask_by_sp(support_masks):
    """support_masks: (B, SHOT, H, W) -> {sp: (SHOT*B, sp*sp, 1) f32}."""
    B, SHOT, H, W = support_masks.shape
    m_flat = support_masks.transpose(1, 0, 2, 3).reshape(SHOT * B, H, W)
    m_flat = m_flat.astype(jnp.float32)
    out = {}
    for _, _, sp in LAYER_SPECS:
        if sp not in out:
            m = bilinear_resize_2d(m_flat, (sp, sp))
            out[sp] = m.reshape(SHOT * B, sp * sp, 1)
    return out


def build_corr_pyramid(feats, masks_by_sp, B, shot):
    """Batched multilayer correlation.  feats[i]: (Nimg, sp, sp, ch) where
    Nimg = 3*B (queries, index m*B+b) + 3*shot*B (supports, (m*shot+i)*B+b).
    Returns [corr_l4, corr_l3, corr_l2], each (3*shot*B, nfeat, sp,sp,sp,sp)."""
    NQ = 3 * B
    corr_levels = []
    f0 = 0
    for nfeat, ch, sp in LAYER_SPECS:
        L = sp * sp
        q_stack = jnp.stack([feats[f][:NQ].reshape(3, B, L, ch)
                             for f in range(f0, f0 + nfeat)], axis=0)
        s_stack = jnp.stack([feats[f][NQ:].reshape(3, shot, B, L, ch)
                             for f in range(f0, f0 + nfeat)], axis=0)
        q_flat = q_stack.reshape(nfeat * 3 * B, L, ch)
        s_flat = s_stack.reshape(nfeat * 3 * shot * B, L, ch)
        corr = correlation(q_flat, s_flat, masks_by_sp[sp], shot, B)
        corr = corr.reshape(nfeat, 3, shot, B, sp, sp, sp, sp)
        corr = corr.transpose(1, 2, 3, 0, 4, 5, 6, 7).reshape(
            3 * shot * B, nfeat, sp, sp, sp, sp)
        corr_levels.append(corr)
        f0 += nfeat
    return [corr_levels[2], corr_levels[1], corr_levels[0]]


def tri_fusenet(rgb, th, d, fp):
    # TODO(synk): TriFusenet source is not in the reference file; implemented as
    # channel-concat + 3x3 conv + ReLU fusion producing 64 channels.
    x = jnp.concatenate([rgb, th, d], axis=-1)     # NHWC concat
    w, b = fp
    return conv2d_nhwc(x, w, b, pad=(1, 1), relu=True, out_dtype=jnp.bfloat16)


# --------------------------------------------------------------------------
# Parameters
# --------------------------------------------------------------------------

def _param(key, shape, scale=0.1):
    return scale * jax.random.normal(key, shape, dtype=jnp.float32)


def _key_iter(key):
    while True:
        key, sub = jax.random.split(key)
        yield sub


def _make_building_block_params(kit, in_channel, out_channels, cfg):
    params = []
    for idx, (outch, (ksz, _)) in enumerate(zip(out_channels, cfg)):
        inch = in_channel if idx == 0 else out_channels[idx - 1]
        params.append(dict(
            w1=_param(next(kit), (outch, inch, ksz, ksz)),
            b1=_param(next(kit), (outch,)),
            w2=_param(next(kit), (outch, inch, ksz, ksz)),
            b2=_param(next(kit), (outch,)),
            gw=jnp.ones((outch,), jnp.float32),
            gb=jnp.zeros((outch,), jnp.float32)))
    return params


def make_hpn_params(kit, inch):
    o1, o2, o3 = 16, 64, 128
    return dict(
        enc4=_make_building_block_params(kit, inch[0], [o1, o2, o3], HPN_CFG['enc4']),
        enc3=_make_building_block_params(kit, inch[1], [o1, o2, o3], HPN_CFG['enc3']),
        enc2=_make_building_block_params(kit, inch[2], [o1, o2, o3], HPN_CFG['enc2']),
        enc43=_make_building_block_params(kit, o3, [o3, o3, o3], HPN_CFG['enc43']),
        enc32=_make_building_block_params(kit, o3, [o3, o3, o3], HPN_CFG['enc32']),
        dec1=[(_param(next(kit), (o3, o3, 3, 3)), _param(next(kit), (o3,))),
              (_param(next(kit), (o2, o3, 3, 3)), _param(next(kit), (o2,)))],
        # TODO(synk): SEMA's HPNLearner head not shown in the reference; output
        # channels inferred as 64 to match TriFusenet / decoder(64->64->2) input.
        dec2=[(_param(next(kit), (o2, o2, 3, 3)), _param(next(kit), (o2,))),
              (_param(next(kit), (o2, o2, 3, 3)), _param(next(kit), (o2,)))],
    )


def make_backbone_params(kit):
    ps = []
    for nfeat, ch, _ in LAYER_SPECS:
        for _ in range(nfeat):
            ps.append((_param(next(kit), (ch, 3, 1, 1)), _param(next(kit), (ch,))))
    return ps


# --------------------------------------------------------------------------
# SEMA_5shot forward (fully batched over modality x shot x batch)
# --------------------------------------------------------------------------

def sema_forward(params, query_img, query_img_th, query_img_d,
                 support_imgs, support_img_ths, support_img_ds, support_masks,
                 shot, use_original_imgsize=False):
    bp = params['backbone']
    B = query_img.shape[0]
    H, W = query_img.shape[-2], query_img.shape[-1]

    # One batched backbone pass: queries (3 modalities) + supports (3 x shot).
    # Query features are identical across the reference's shot loop, so they
    # are computed once (same semantics in eval mode).
    q_all = jnp.stack([query_img, query_img_th, query_img_d], axis=0)        # (3,B,3,H,W)
    s_all = jnp.stack([support_imgs, support_img_ths, support_img_ds], axis=0)
    s_all = s_all.transpose(0, 2, 1, 3, 4, 5)                                # (3,SHOT,B,3,H,W)
    imgs = jnp.concatenate([q_all.reshape(3 * B, 3, H, W),
                            s_all.reshape(3 * shot * B, 3, H, W)], axis=0)
    feats = extract_feats(imgs, bp)

    masks_by_sp = build_mask_by_sp(support_masks)
    corr_pyramid = build_corr_pyramid(feats, masks_by_sp, B, shot)

    # One hpn_learner pass over all 3*shot*B hyper-correlations (shared weights).
    dec = hpn_learner(corr_pyramid, params['hpn'])                           # NHWC
    h2, w2, ch = dec.shape[1], dec.shape[2], dec.shape[3]
    dec = dec.reshape(3, shot, B, h2, w2, ch).astype(jnp.float32)
    dec = jnp.mean(dec, axis=1)                                              # shot average
    rgb, th, d = dec[0], dec[1], dec[2]

    logit = tri_fusenet(rgb, th, d, params['fuse'])                          # NHWC
    (w1, b1), (w2_, b2) = params['decoder']
    logit = conv2d_nhwc(logit, w1, b1, pad=(1, 1), relu=True, out_dtype=jnp.bfloat16)
    logit = conv2d_nhwc(logit, w2_, b2, pad=(1, 1), relu=False, out_dtype=jnp.float32)
    logit = logit.transpose(0, 3, 1, 2)                                      # NCHW (B,2,h,w)
    if not use_original_imgsize:
        logit = interpolate_nchw(
            logit, (support_imgs.shape[-2], support_imgs.shape[-1]))
    return logit


# --------------------------------------------------------------------------
# Main
# --------------------------------------------------------------------------

if __name__ == "__main__":
    kit = _key_iter(jax.random.PRNGKey(0))
    params = dict(
        backbone=make_backbone_params(kit),
        hpn=make_hpn_params(kit, inch=[3, 6, 4]),   # reversed(nbottlenecks[-3:])
        fuse=(_param(next(kit), (64, 192, 3, 3)), _param(next(kit), (64,))),
        decoder=[(_param(next(kit), (64, 64, 3, 3)), _param(next(kit), (64,))),
                 (_param(next(kit), (2, 64, 3, 3)), _param(next(kit), (2,)))],
    )

    B, SHOT, H, W = 2, 2, 32, 32
    ks = jax.random.split(jax.random.PRNGKey(0), 8)
    query_img = jax.random.normal(ks[0], (B, 3, H, W), jnp.float32)
    query_img_th = jax.random.normal(ks[1], (B, 3, H, W), jnp.float32)
    query_img_d = jax.random.normal(ks[2], (B, 3, H, W), jnp.float32)
    support_imgs = jax.random.normal(ks[3], (B, SHOT, 3, H, W), jnp.float32)
    support_img_ths = jax.random.normal(ks[4], (B, SHOT, 3, H, W), jnp.float32)
    support_img_ds = jax.random.normal(ks[5], (B, SHOT, 3, H, W), jnp.float32)
    support_masks = (jax.random.uniform(ks[6], (B, SHOT, H, W)) > 0.5).astype(jnp.float32)

    fwd = jax.jit(functools.partial(sema_forward, shot=SHOT,
                                    use_original_imgsize=False))
    out = fwd(params, query_img, query_img_th, query_img_d,
              support_imgs, support_img_ths, support_img_ds, support_masks)
    out = jax.block_until_ready(out)
    assert out.shape == (B, 2, H, W), out.shape
    assert bool(jnp.all(jnp.isfinite(out)))
    print("KERNEL_OK")
</pallas_src>

<mosaic_0001>
module attributes {stable_mosaic.version = 11 : i64} {
  func.func @_matmul_bias_kernel(%arg0: i32, %arg1: memref<864x32xf32, #tpu.memory_space<vmem>>, %arg2: memref<32x128xf32, #tpu.memory_space<vmem>>, %arg3: memref<1x128xf32, #tpu.memory_space<vmem>>, %arg4: memref<864x128xf32, #tpu.memory_space<vmem>>) attributes {dimension_semantics = [#tpu.dimension_semantics<parallel>], iteration_bounds = array<i64: 2>, scalar_prefetch = 0 : i64, scratch_operands = 0 : i64, tpu.core_type = #tpu.core_type<tc>, window_params = [{transform_indices = @transform_0, window_bounds = array<i64: 864, 32>}, {pipeline_mode = #tpu.pipeline_mode<synchronous>, transform_indices = @transform_1, window_bounds = array<i64: 32, 128>}, {pipeline_mode = #tpu.pipeline_mode<synchronous>, transform_indices = @transform_2, window_bounds = array<i64: 1, 128>}, {transform_indices = @transform_3, window_bounds = array<i64: 864, 128>}]} {
    %c0 = arith.constant 0 : index
    %c0_0 = arith.constant 0 : index
    %0 = vector.load %arg1[%c0, %c0_0] : memref<864x32xf32, #tpu.memory_space<vmem>>, vector<864x32xf32>
    %c0_1 = arith.constant 0 : index
    %c0_2 = arith.constant 0 : index
    %1 = vector.load %arg2[%c0_1, %c0_2] : memref<32x128xf32, #tpu.memory_space<vmem>>, vector<32x128xf32>
    %cst = arith.constant dense<0.000000e+00> : vector<864x128xf32>
    %2 = tpu.matmul %0, %1, %cst {dimension_numbers = #tpu.dot_dimension_numbers<[1], [0], [0], [1], [0, 0, 1, 1], [], []>} : vector<864x32xf32>, vector<32x128xf32>, vector<864x128xf32> -> vector<864x128xf32>
    %c0_3 = arith.constant 0 : index
    %c0_4 = arith.constant 0 : index
    %3 = vector.load %arg3[%c0_3, %c0_4] : memref<1x128xf32, #tpu.memory_space<vmem>>, vector<1x128xf32>
    %4 = vector.broadcast %3 : vector<1x128xf32> to vector<864x128xf32>
    %5 = arith.addf %2, %4 : vector<864x128xf32>
    %c0_5 = arith.constant 0 : index
    %c0_6 = arith.constant 0 : index
    %6 = vector.load %arg4[%c0_5, %c0_6] : memref<864x128xf32, #tpu.memory_space<vmem>>, vector<864x128xf32>
    tpu.vector_store %arg4[%c0_5, %c0_6], %5 {strides = array<i32>} : memref<864x128xf32, #tpu.memory_space<vmem>>, vector<864x128xf32>,
    return
  }
  func.func @transform_0(%arg0: i32) -> (i32, i32) {
    %c0_i32 = arith.constant 0 : i32
    %c0_i32_0 = arith.constant 0 : i32
    return %arg0, %c0_i32 : i32, i32
  }
  func.func @transform_1(%arg0: i32) -> (i32, i32) {
    %c0_i32 = arith.constant 0 : i32
    %c0_i32_0 = arith.constant 0 : i32
    %c0_i32_1 = arith.constant 0 : i32
    return %c0_i32, %c0_i32_0 : i32, i32
  }
  func.func @transform_2(%arg0: i32) -> (i32, i32) {
    %c0_i32 = arith.constant 0 : i32
    %c0_i32_0 = arith.constant 0 : i32
    %c0_i32_1 = arith.constant 0 : i32
    return %c0_i32, %c0_i32_0 : i32, i32
  }
  func.func @transform_3(%arg0: i32) -> (i32, i32) {
    %c0_i32 = arith.constant 0 : i32
    %c0_i32_0 = arith.constant 0 : i32
    return %arg0, %c0_i32 : i32, i32
  }
}

</mosaic_0001>

<bundles_post_ra>
// kernel: tpu_custom_call.1
= control target key start
LH: loop header
LB: loop body
LE: loop exit
PB: predicated region body
PF: predicated region fallthrough
CT: control target
= control target key end

     0   :  { %8 = vsyncpa [#allocation3], 0  ;;  %s2506_s0 = inlined_call_operand.vmem [shape: f32[1728,32], index: 0, kind: input, shape index: {}]   ;;  %s2507_s1 = inlined_call_operand.vmem [shape: f32[32,128], index: 1, kind: input, shape index: {}]   ;;  %s2508_s2 = inlined_call_operand.vmem [shape: f32[1,128], index: 2, kind: input, shape index: {}]   ;;  %s2509_s3 = inlined_call_operand.hbm [shape: f32[1728,128], index: 3, kind: output, shape index: {}]  }
   0x1   :  { %10 = vsyncpa [#allocation3 + $0x1], 0  ;;  %s1946_s12 = smov 0   ;;  %s1948_s13 = smov 0  }
   0x2   :  { %s1950_s14 = smov 0   ;;  %s1952_s15 = smov 0  }
   0x3 LB: > { %s1967_s16 = sadd.s32 4294967295, %s1921_s15   ;;  %s1405_s17 = sadd.s32 4294967294, %s1921_s15   ;;  %s1921_s15 = sphi %s1952_s15, %s2515_s15   ;;  %s1917_s14 = sphi %s1950_s14, %s2514_s14   ;;  %s1913_s13 = sphi %s1948_s13, %s2513_s13   ;;  %s1909_s12 = sphi %s1946_s12, %s2512_s12  }
   0x4   : > { %s1971_s18 = sadd.s32 1, %s1921_s15   ;;  %s91_s19 = sadd.s32 1, %s1917_s14 }
   0x5   : > { %s88_s20 = ssub.s32 %s1921_s15, %s1971_s18  ;;  %p101_p0 = scmp.ne.s32.totalorder %s1917_s14, %s1913_s13 }
   0x6   : > { %p89_p1 = scmp.eq.s32.totalorder %s88_s20, 0  ;;  %p102_p2 = scmp.eq.s32.totalorder %s1967_s16, 1 }
   0x7   : > { %p107_p3 = scmp.ne.s32.totalorder %s1913_s13, %s1909_s12  ;;  %p108_p4 = scmp.eq.s32.totalorder %s1405_s17, 1 }
   0x8   : > { %s1982_s21 = scalar_select %p89_p1, %s1917_s14, %s91_s19  }
   0x9   : > { %p1984_p5 = por %p102_p2, %p101_p0  ;;  %p1988_p6 = por %p108_p4, %p107_p3 }
   0xa   : > { %p1408_p7 = scmp.ge.s32.totalorder %s1921_s15, 1  ;;  %p141_p8 = scmp.lt.s32.totalorder %s1921_s15, 3 }
   0xc   : > { %p142_p9 = pnand %p1408_p7, %p141_p8 }
   0xd   : > { %v280_v0 = vld [vmem:[%s2507_s1] sm:$0xff] (!%p142_p9)  ;;  %v281_v1 = vld [vmem:[%s2507_s1 + $0x8] sm:$0xff] (!%p142_p9)  ;;  %v282_v2 = vld [vmem:[%s2507_s1 + $0x10] sm:$0xff] (!%p142_p9)  ;;  %s165_s30 = smul.u32 (!%p142_p9), 108, %s1967_s16  ;;  %vm291_vm0 = vcmask (!%p142_p9), 261120   ;;  %s162_s10 = sand.u32 (!%p142_p9), 1, %s1913_s13  }
   0xe   : > { %145 = sbr.rel (%p142_p9) target bundleno = 360 (0x168), region = 32  ;;  %v1805_v3 = vpack.c.bf16 (!%p142_p9), %v281_v1, %v280_v0  ;;  %v283_v4 = vld [vmem:[%s2507_s1 + $0x18] sm:$0xff] (!%p142_p9)  ;;  %s2465_s28 = scalar_lea.sflag (!%p142_p9), [#allocation3], %s162_s10 }
   0xf   : > { %v1809_v5 = vpack.c.bf16 (!%p142_p9), %v283_v4, %v282_v2  ;;  %p166_p10 = scmp.lt.s32.totalorder (!%p142_p9), %s165_s30, 215  ;;  %s1817_s11 = smul.u32 (!%p142_p9), 864, %s162_s10 }
  0x10   : > { %1806 = vmatprep.subr.bf16.mxu0 (!%p142_p9), %v1805_v3  ;;  %1813 = vmatprep.subr.bf16.mxu1 (!%p142_p9), %v1805_v3  ;;  %s1522_s24 = smul.u32 (!%p142_p9), 13824, %s1967_s16 }
  0x11   : > { %1808 = vmatpush3.bf16.msra.mxu0 (!%p142_p9), %v1805_v3  ;;  %1815 = vmatpush3.bf16.msra.mxu1 (!%p142_p9), %v1805_v3  ;;  %s2240_s20 = scalar_lea.vmem (!%p142_p9), [#allocation2], %s1817_s11 }
  0x12   : > { %1810 = vmatprep.subr.bf16.mxu0 (!%p142_p9), %v1809_v5  ;;  %1814 = vmatprep.subr.bf16.mxu1 (!%p142_p9), %v1809_v5  ;;  %s1343_s25 = sshll.u32 (!%p142_p9), %s2240_s20, 4  ;;  %s2453_s27 = scalar_lea.hbm (!%p142_p9), %s2509_s3, %s1522_s24  ;;  %s2455_s25 = int_to_ptr.vmem [resolvable:$true] %s1343_s25 }
  0x13   : > { %s1859_s29 = scalar_lea.vmem (!%p142_p9), %s2455_s25, 13824 }
  0x14   : > { %p1860_p11 = scmp.ne.s32.totalorder (!%p142_p9), %s2455_s25, %s1859_s29 }
  0x15   : > { %s2517_s30 = smov (!%p166_p10, %s165_s30), 215  ;;  %1812 = vmatpush3.bf16.msra.mxu0 %v1809_v5  ;;  %1816 = vmatpush3.bf16.msra.mxu1 %v1809_v5 }
  0x16   : > { %s1409_s6 = sshll.u32 %s2517_s30, 3  ;;  %p1861_p12 = pnand %p1860_p11, %p1984_p5 }
  0x17   : > { %s2010_s9 = scalar_lea.vmem %s2506_s0, %s1409_s6  ;;  %s1923_s30 = smov [#allocation2]  }
  0x18   : > { %v172_v6 = vld [vmem:[%s2010_s9] sm:$0xff]  ;;  %v226_v7 = vld [vmem:[%s2010_s9 + $0x1b0] sm:$0xff]  ;;  %v173_v8 = vld [vmem:[%s2010_s9 + $0x8] sm:$0xff]  ;;  %p1862_p13 = pneg %p1861_p12  ;;  %s1863_s4 = sshll.u32 %s1923_s30, 4  ;;  %s1864_s4 = int_to_ptr.vmem [resolvable:$false] %s1863_s4 }
  0x19   : > { %1643 = vmatprep.mubr.msk.f32.mxu0 %vm291_vm0, %v172_v6  ;;  %1724 = vmatprep.mubr.msk.f32.mxu1 %vm291_vm0, %v226_v7  ;;  %v227_v9 = vld [vmem:[%s2010_s9 + $0x1b8] sm:$0xff]  ;;  %v174_v10 = vld [vmem:[%s2010_s9 + $0x10] sm:$0xff]  ;;  %v228_v11 = vld [vmem:[%s2010_s9 + $0x1c0] sm:$0xff]  ;;  %s1865_s5 = scalar_lea.vmem %s1864_s4, 27648  ;;  %p1866_p0 = scmp.lt.s32.totalorder %s2455_s25, %s1864_s4 }
  0x1a   : > { %1644 = vmatmul.mubr.msk.f32.vlgmr.msra.gmra.mrb[0].mxu0 %vm291_vm0, %v173_v8  ;;  %1725 = vmatmul.mubr.msk.f32.vlgmr.msra.gmra.mrb[0].mxu1 %vm291_vm0, %v227_v9  ;;  %v175_v12 = vld [vmem:[%s2010_s9 + $0x18] sm:$0xff]  ;;  %v229_v13 = vld [vmem:[%s2010_s9 + $0x1c8] sm:$0xff]  ;;  %v176_v14 = vld [vmem:[%s2010_s9 + $0x20] sm:$0xff]  ;;  %p1867_p1 = scmp.lt.s32.totalorder %s1865_s5, %s1859_s29 }
  0x1b   : > { %1646 = vmatprep.mubr.msk.f32.mxu0 %vm291_vm0, %v174_v10  ;;  %1727 = vmatprep.mubr.msk.f32.mxu1 %vm291_vm0, %v228_v11  ;;  %v230_v15 = vld [vmem:[%s2010_s9 + $0x1d0] sm:$0xff]  ;;  %v177_v16 = vld [vmem:[%s2010_s9 + $0x28] sm:$0xff]  ;;  %v231_v17 = vld [vmem:[%s2010_s9 + $0x1d8] sm:$0xff] }
  0x1c   : > { %v178_v18 = vld [vmem:[%s2010_s9 + $0x30] sm:$0xff]  ;;  %v232_v19 = vld [vmem:[%s2010_s9 + $0x1e0] sm:$0xff]  ;;  %v179_v20 = vld [vmem:[%s2010_s9 + $0x38] sm:$0xff]  ;;  %p1868_p2 = por %p1867_p1, %p1866_p0 }
  0x1d   : > { %v233_v21 = vld [vmem:[%s2010_s9 + $0x1e8] sm:$0xff]  ;;  %v180_v22 = vld [vmem:[%s2010_s9 + $0x40] sm:$0xff]  ;;  %v234_v23 = vld [vmem:[%s2010_s9 + $0x1f0] sm:$0xff] }
  0x1e   : > { %1647 = vmatmul.mubr.msk.f32.gmra.mrb[2].mxu0 %vm291_vm0, %v175_v12  ;;  %1728 = vmatmul.mubr.msk.f32.gmra.mrb[2].mxu1 %vm291_vm0, %v229_v13  ;;  %v181_v24 = vld [vmem:[%s2010_s9 + $0x48] sm:$0xff]  ;;  %v235_v25 = vld [vmem:[%s2010_s9 + $0x1f8] sm:$0xff]  ;;  %v182_v26 = vld [vmem:[%s2010_s9 + $0x50] sm:$0xff]  ;;  %p1869_p3 = pnand %p1868_p2, %p1862_p13 }
  0x1f   : > { %1649 = vmatprep.mubr.msk.f32.mxu0 %vm291_vm0, %v176_v14  ;;  %1730 = vmatprep.mubr.msk.f32.mxu1 %vm291_vm0, %v230_v15  ;;  %v236_v27 = vld [vmem:[%s2010_s9 + $0x200] sm:$0xff]  ;;  %v183_v28 = vld [vmem:[%s2010_s9 + $0x58] sm:$0xff]  ;;  %v237_v29 = vld [vmem:[%s2010_s9 + $0x208] sm:$0xff] }
  0x20   : > { %v184_v30 = vld [vmem:[%s2010_s9 + $0x60] sm:$0xff]  ;;  %v238_v31 = vld [vmem:[%s2010_s9 + $0x210] sm:$0xff]  ;;  %v185_v32 = vld [vmem:[%s2010_s9 + $0x68] sm:$0xff] }
  0x21   : > { %v239_v33 = vld [vmem:[%s2010_s9 + $0x218] sm:$0xff]  ;;  %v186_v34 = vld [vmem:[%s2010_s9 + $0x70] sm:$0xff]  ;;  %v240_v35 = vld [vmem:[%s2010_s9 + $0x220] sm:$0xff] }
  0x22   : > { %1650 = vmatmul.mubr.msk.f32.gmra.mrb[4].mxu0 %vm291_vm0, %v177_v16  ;;  %1731 = vmatmul.mubr.msk.f32.gmra.mrb[4].mxu1 %vm291_vm0, %v231_v17  ;;  %v187_v36 = vld [vmem:[%s2010_s9 + $0x78] sm:$0xff]  ;;  %v241_v37 = vld [vmem:[%s2010_s9 + $0x228] sm:$0xff]  ;;  %v188_v38 = vld [vmem:[%s2010_s9 + $0x80] sm:$0xff] }
  0x23   : > { %1652 = vmatprep.mubr.msk.f32.mxu0 %vm291_vm0, %v178_v18  ;;  %1733 = vmatprep.mubr.msk.f32.mxu1 %vm291_vm0, %v232_v19  ;;  %v242_v39 = vld [vmem:[%s2010_s9 + $0x230] sm:$0xff]  ;;  %v189_v40 = vld [vmem:[%s2010_s9 + $0x88] sm:$0xff]  ;;  %v243_v41 = vld [vmem:[%s2010_s9 + $0x238] sm:$0xff] }
  0x24   : > { %v190_v42 = vld [vmem:[%s2010_s9 + $0x90] sm:$0xff]  ;;  %v244_v43 = vld [vmem:[%s2010_s9 + $0x240] sm:$0xff]  ;;  %v191_v44 = vld [vmem:[%s2010_s9 + $0x98] sm:$0xff] }
  0x25   : > { %v245_v45 = vld [vmem:[%s2010_s9 + $0x248] sm:$0xff]  ;;  %v192_v46 = vld [vmem:[%s2010_s9 + $0xa0] sm:$0xff]  ;;  %v246_v47 = vld [vmem:[%s2010_s9 + $0x250] sm:$0xff] }
  0x26   : > { %1653 = vmatmul.mubr.msk.f32.gmra.mrb[6].mxu0 %vm291_vm0, %v179_v20  ;;  %1734 = vmatmul.mubr.msk.f32.gmra.mrb[6].mxu1 %vm291_vm0, %v233_v21  ;;  %v193_v48 = vld [vmem:[%s2010_s9 + $0xa8] sm:$0xff]  ;;  %v247_v49 = vld [vmem:[%s2010_s9 + $0x258] sm:$0xff]  ;;  %v194_v50 = vld [vmem:[%s2010_s9 + $0xb0] sm:$0xff] }
  0x27   : > { %1655 = vmatprep.mubr.msk.f32.mxu0 %vm291_vm0, %v180_v22  ;;  %1736 = vmatprep.mubr.msk.f32.mxu1 %vm291_vm0, %v234_v23  ;;  %v248_v51 = vld [vmem:[%s2010_s9 + $0x260] sm:$0xff]  ;;  %v195_v52 = vld [vmem:[%s2010_s9 + $0xb8] sm:$0xff]  ;;  %v249_v53 = vld [vmem:[%s2010_s9 + $0x268] sm:$0xff] }
  0x28   : > { %v196_v54 = vld [vmem:[%s2010_s9 + $0xc0] sm:$0xff]  ;;  %v250_v55 = vld [vmem:[%s2010_s9 + $0x270] sm:$0xff]  ;;  %v197_v56 = vld [vmem:[%s2010_s9 + $0xc8] sm:$0xff] }
  0x29   : > { %v251_v57 = vld [vmem:[%s2010_s9 + $0x278] sm:$0xff]  ;;  %v198_v58 = vld [vmem:[%s2010_s9 + $0xd0] sm:$0xff]  ;;  %v252_v59 = vld [vmem:[%s2010_s9 + $0x280] sm:$0xff] }
  0x2a   : > { %1656 = vmatmul.mubr.msk.f32.gmra.mrb[8].mxu0 %vm291_vm0, %v181_v24  ;;  %1737 = vmatmul.mubr.msk.f32.gmra.mrb[8].mxu1 %vm291_vm0, %v235_v25  ;;  %v199_v60 = vld [vmem:[%s2010_s9 + $0xd8] sm:$0xff]  ;;  %v253_v61 = vld [vmem:[%s2010_s9 + $0x288] sm:$0xff]  ;;  %v200_v62 = vld [vmem:[%s2010_s9 + $0xe0] sm:$0xff] }
  0x2b   : > { %1658 = vmatprep.mubr.msk.f32.mxu0 %vm291_vm0, %v182_v26  ;;  %1739 = vmatprep.mubr.msk.f32.mxu1 %vm291_vm0, %v236_v27  ;;  %v254_v63 = vld [vmem:[%s2010_s9 + $0x290] sm:$0xff]  ;;  %v201_v0 = vld [vmem:[%s2010_s9 + $0xe8] sm:$0xff]  ;;  %v255_v1 = vld [vmem:[%s2010_s9 + $0x298] sm:$0xff] }
  0x2c   : > { %v202_v2 = vld [vmem:[%s2010_s9 + $0xf0] sm:$0xff]  ;;  %v256_v3 = vld [vmem:[%s2010_s9 + $0x2a0] sm:$0xff]  ;;  %v203_v4 = vld [vmem:[%s2010_s9 + $0xf8] sm:$0xff] }
  0x2d   : > { %v257_v5 = vld [vmem:[%s2010_s9 + $0x2a8] sm:$0xff]  ;;  %v204_v6 = vld [vmem:[%s2010_s9 + $0x100] sm:$0xff]  ;;  %v258_v7 = vld [vmem:[%s2010_s9 + $0x2b0] sm:$0xff] }
  0x2e   : > { %1659 = vmatmul.mubr.msk.f32.gmra.mrb[10].mxu0 %vm291_vm0, %v183_v28  ;;  %1740 = vmatmul.mubr.msk.f32.gmra.mrb[10].mxu1 %vm291_vm0, %v237_v29  ;;  %v205_v8 = vld [vmem:[%s2010_s9 + $0x108] sm:$0xff]  ;;  %v259_v9 = vld [vmem:[%s2010_s9 + $0x2b8] sm:$0xff]  ;;  %v206_v10 = vld [vmem:[%s2010_s9 + $0x110] sm:$0xff] }
  0x2f   : > { %1661 = vmatprep.mubr.msk.f32.mxu0 %vm291_vm0, %v184_v30  ;;  %1742 = vmatprep.mubr.msk.f32.mxu1 %vm291_vm0, %v238_v31  ;;  %v260_v11 = vld [vmem:[%s2010_s9 + $0x2c0] sm:$0xff]  ;;  %v207_v12 = vld [vmem:[%s2010_s9 + $0x118] sm:$0xff]  ;;  %v261_v13 = vld [vmem:[%s2010_s9 + $0x2c8] sm:$0xff] }
  0x30   : > { %v208_v14 = vld [vmem:[%s2010_s9 + $0x120] sm:$0xff]  ;;  %v262_v15 = vld [vmem:[%s2010_s9 + $0x2d0] sm:$0xff]  ;;  %v209_v16 = vld [vmem:[%s2010_s9 + $0x128] sm:$0xff] }
  0x31   : > { %v263_v17 = vld [vmem:[%s2010_s9 + $0x2d8] sm:$0xff]  ;;  %v210_v18 = vld [vmem:[%s2010_s9 + $0x130] sm:$0xff]  ;;  %v264_v19 = vld [vmem:[%s2010_s9 + $0x2e0] sm:$0xff] }
  0x32   : > { %1662 = vmatmul.mubr.msk.f32.gmra.mrb[12].mxu0 %vm291_vm0, %v185_v32  ;;  %1743 = vmatmul.mubr.msk.f32.gmra.mrb[12].mxu1 %vm291_vm0, %v239_v33  ;;  %v211_v20 = vld [vmem:[%s2010_s9 + $0x138] sm:$0xff]  ;;  %v265_v21 = vld [vmem:[%s2010_s9 + $0x2e8] sm:$0xff]  ;;  %v212_v22 = vld [vmem:[%s2010_s9 + $0x140] sm:$0xff] }
  0x33   : > { %1664 = vmatprep.mubr.msk.f32.mxu0 %vm291_vm0, %v186_v34  ;;  %1745 = vmatprep.mubr.msk.f32.mxu1 %vm291_vm0, %v240_v35  ;;  %v266_v23 = vld [vmem:[%s2010_s9 + $0x2f0] sm:$0xff]  ;;  %v213_v24 = vld [vmem:[%s2010_s9 + $0x148] sm:$0xff]  ;;  %v267_v25 = vld [vmem:[%s2010_s9 + $0x2f8] sm:$0xff] }
  0x34   : > { %v214_v26 = vld [vmem:[%s2010_s9 + $0x150] sm:$0xff]  ;;  %v268_v27 = vld [vmem:[%s2010_s9 + $0x300] sm:$0xff]  ;;  %v215_v28 = vld [vmem:[%s2010_s9 + $0x158] sm:$0xff] }
  0x35   : > { %v269_v29 = vld [vmem:[%s2010_s9 + $0x308] sm:$0xff]  ;;  %v216_v30 = vld [vmem:[%s2010_s9 + $0x160] sm:$0xff]  ;;  %v270_v31 = vld [vmem:[%s2010_s9 + $0x310] sm:$0xff] }
  0x36   : > { %1665 = vmatmul.mubr.msk.f32.gmra.mrb[14].mxu0 %vm291_vm0, %v187_v36  ;;  %1746 = vmatmul.mubr.msk.f32.gmra.mrb[14].mxu1 %vm291_vm0, %v241_v37  ;;  %v217_v32 = vld [vmem:[%s2010_s9 + $0x168] sm:$0xff]  ;;  %v271_v33 = vld [vmem:[%s2010_s9 + $0x318] sm:$0xff]  ;;  %v218_v34 = vld [vmem:[%s2010_s9 + $0x170] sm:$0xff] }
  0x37   : > { %1667 = vmatprep.mubr.msk.f32.mxu0 %vm291_vm0, %v188_v38  ;;  %1748 = vmatprep.mubr.msk.f32.mxu1 %vm291_vm0, %v242_v39  ;;  %v272_v35 = vld [vmem:[%s2010_s9 + $0x320] sm:$0xff]  ;;  %v219_v36 = vld [vmem:[%s2010_s9 + $0x178] sm:$0xff]  ;;  %v273_v37 = vld [vmem:[%s2010_s9 + $0x328] sm:$0xff] }
  0x38   : > { %v220_v38 = vld [vmem:[%s2010_s9 + $0x180] sm:$0xff]  ;;  %v274_v39 = vld [vmem:[%s2010_s9 + $0x330] sm:$0xff] }
  0x3a   : > { %1668 = vmatmul.mubr.msk.f32.gmra.mrb[16].mxu0 %vm291_vm0, %v189_v40  ;;  %1749 = vmatmul.mubr.msk.f32.gmra.mrb[16].mxu1 %vm291_vm0, %v243_v41  ;;  %v221_v40 = vld [vmem:[%s2010_s9 + $0x188] sm:$0xff]  ;;  %v275_v41 = vld [vmem:[%s2010_s9 + $0x338] sm:$0xff] }
  0x3b   : > { %1670 = vmatprep.mubr.msk.f32.mxu0 %vm291_vm0, %v190_v42  ;;  %1751 = vmatprep.mubr.msk.f32.mxu1 %vm291_vm0, %v244_v43  ;;  %v222_v42 = vld [vmem:[%s2010_s9 + $0x190] sm:$0xff]  ;;  %v276_v43 = vld [vmem:[%s2010_s9 + $0x340] sm:$0xff] }
  0x3e   : > { %1671 = vmatmul.mubr.msk.f32.gmra.mrb[18].mxu0 %vm291_vm0, %v191_v44  ;;  %1752 = vmatmul.mubr.msk.f32.gmra.mrb[18].mxu1 %vm291_vm0, %v245_v45  ;;  %v223_v44 = vld [vmem:[%s2010_s9 + $0x198] sm:$0xff]  ;;  %v277_v45 = vld [vmem:[%s2010_s9 + $0x348] sm:$0xff] }
  0x3f   : > { %1673 = vmatprep.mubr.msk.f32.mxu0 %vm291_vm0, %v192_v46  ;;  %1754 = vmatprep.mubr.msk.f32.mxu1 %vm291_vm0, %v246_v47  ;;  %v224_v46 = vld [vmem:[%s2010_s9 + $0x1a0] sm:$0xff]  ;;  %v278_v47 = vld [vmem:[%s2010_s9 + $0x350] sm:$0xff] }
  0x42   : > { %1674 = vmatmul.mubr.msk.f32.gmra.mrb[20].mxu0 %vm291_vm0, %v193_v48  ;;  %1755 = vmatmul.mubr.msk.f32.gmra.mrb[20].mxu1 %vm291_vm0, %v247_v49  ;;  %v225_v48 = vld [vmem:[%s2010_s9 + $0x1a8] sm:$0xff]  ;;  %v279_v49 = vld [vmem:[%s2010_s9 + $0x358] sm:$0xff] }
  0x43   : > { %1676 = vmatprep.mubr.msk.f32.mxu0 %vm291_vm0, %v194_v50  ;;  %1757 = vmatprep.mubr.msk.f32.mxu1 %vm291_vm0, %v248_v51  ;;  %v2234_v50 = vld [vmem:[%s2508_s2] ss:$0 sm:$0xff] }
  0x46   : > { %1677 = vmatmul.mubr.msk.f32.gmra.mrb[22].mxu0 %vm291_vm0, %v195_v52  ;;  %1758 = vmatmul.mubr.msk.f32.gmra.mrb[22].mxu1 %vm291_vm0, %v249_v53 }
  0x47   : > { %1679 = vmatprep.mubr.msk.f32.mxu0 %vm291_vm0, %v196_v54  ;;  %1760 = vmatprep.mubr.msk.f32.mxu1 %vm291_vm0, %v250_v55 }
  0x4a   : > { %1680 = vmatmul.mubr.msk.f32.gmra.mrb[24].mxu0 %vm291_vm0, %v197_v56  ;;  %1761 = vmatmul.mubr.msk.f32.gmra.mrb[24].mxu1 %vm291_vm0, %v251_v57 }
  0x4b   : > { %1682 = vmatprep.mubr.msk.f32.mxu0 %vm291_vm0, %v198_v58  ;;  %1763 = vmatprep.mubr.msk.f32.mxu1 %vm291_vm0, %v252_v59 }
  0x4e   : > { %1683 = vmatmul.mubr.msk.f32.gmra.mrb[26].mxu0 %vm291_vm0, %v199_v60  ;;  %1764 = vmatmul.mubr.msk.f32.gmra.mrb[26].mxu1 %vm291_vm0, %v253_v61 }
  0x4f   : > { %1685 = vmatprep.mubr.msk.f32.mxu0 %vm291_vm0, %v200_v62  ;;  %1766 = vmatprep.mubr.msk.f32.mxu1 %vm291_vm0, %v254_v63 }
  0x52   : > { %1686 = vmatmul.mubr.msk.f32.gmra.mrb[28].mxu0 %vm291_vm0, %v201_v0  ;;  %1767 = vmatmul.mubr.msk.f32.gmra.mrb[28].mxu1 %vm291_vm0, %v255_v1 }
  0x53   : > { %1688 = vmatprep.mubr.msk.f32.mxu0 %vm291_vm0, %v202_v2  ;;  %1769 = vmatprep.mubr.msk.f32.mxu1 %vm291_vm0, %v256_v3 }
  0x56   : > { %1689 = vmatmul.mubr.msk.f32.gmra.mrb[30].mxu0 %vm291_vm0, %v203_v4  ;;  %1770 = vmatmul.mubr.msk.f32.gmra.mrb[30].mxu1 %vm291_vm0, %v257_v5 }
  0x57   : > { %1691 = vmatprep.mubr.msk.f32.mxu0 %vm291_vm0, %v204_v6  ;;  %1772 = vmatprep.mubr.msk.f32.mxu1 %vm291_vm0, %v258_v7 }
  0x5a   : > { %1692 = vmatmul.mubr.msk.f32.gmra.mrb[32].mxu0 %vm291_vm0, %v205_v8  ;;  %1773 = vmatmul.mubr.msk.f32.gmra.mrb[32].mxu1 %vm291_vm0, %v259_v9 }
  0x5b   : > { %1694 = vmatprep.mubr.msk.f32.mxu0 %vm291_vm0, %v206_v10  ;;  %1775 = vmatprep.mubr.msk.f32.mxu1 %vm291_vm0, %v260_v11 }
  0x5e   : > { %1695 = vmatmul.mubr.msk.f32.gmra.mrb[34].mxu0 %vm291_vm0, %v207_v12  ;;  %1776 = vmatmul.mubr.msk.f32.gmra.mrb[34].mxu1 %vm291_vm0, %v261_v13 }
  0x5f   : > { %1697 = vmatprep.mubr.msk.f32.mxu0 %vm291_vm0, %v208_v14  ;;  %1778 = vmatprep.mubr.msk.f32.mxu1 %vm291_vm0, %v262_v15 }
  0x62   : > { %1698 = vmatmul.mubr.msk.f32.gmra.mrb[36].mxu0 %vm291_vm0, %v209_v16  ;;  %1779 = vmatmul.mubr.msk.f32.gmra.mrb[36].mxu1 %vm291_vm0, %v263_v17 }
  0x63   : > { %1700 = vmatprep.mubr.msk.f32.mxu0 %vm291_vm0, %v210_v18  ;;  %1781 = vmatprep.mubr.msk.f32.mxu1 %vm291_vm0, %v264_v19 }
  0x66   : > { %1701 = vmatmul.mubr.msk.f32.gmra.mrb[38].mxu0 %vm291_vm0, %v211_v20  ;;  %1782 = vmatmul.mubr.msk.f32.gmra.mrb[38].mxu1 %vm291_vm0, %v265_v21 }
  0x67   : > { %1703 = vmatprep.mubr.msk.f32.mxu0 %vm291_vm0, %v212_v22  ;;  %1784 = vmatprep.mubr.msk.f32.mxu1 %vm291_vm0, %v266_v23 }
  0x6a   : > { %1704 = vmatmul.mubr.msk.f32.gmra.mrb[40].mxu0 %vm291_vm0, %v213_v24  ;;  %1785 = vmatmul.mubr.msk.f32.gmra.mrb[40].mxu1 %vm291_vm0, %v267_v25 }
  0x6b   : > { %1706 = vmatprep.mubr.msk.f32.mxu0 %vm291_vm0, %v214_v26  ;;  %1787 = vmatprep.mubr.msk.f32.mxu1 %vm291_vm0, %v268_v27 }
  0x6e   : > { %1707 = vmatmul.mubr.msk.f32.gmra.mrb[42].mxu0 %vm291_vm0, %v215_v28  ;;  %1788 = vmatmul.mubr.msk.f32.gmra.mrb[42].mxu1 %vm291_vm0, %v269_v29 }
  0x6f   : > { %1709 = vmatprep.mubr.msk.f32.mxu0 %vm291_vm0, %v216_v30  ;;  %1790 = vmatprep.mubr.msk.f32.mxu1 %vm291_vm0, %v270_v31 }
  0x72   : > { %1710 = vmatmul.mubr.msk.f32.gmra.mrb[44].mxu0 %vm291_vm0, %v217_v32  ;;  %1791 = vmatmul.mubr.msk.f32.gmra.mrb[44].mxu1 %vm291_vm0, %v271_v33 }
  0x73   : > { %1712 = vmatprep.mubr.msk.f32.mxu0 %vm291_vm0, %v218_v34  ;;  %1793 = vmatprep.mubr.msk.f32.mxu1 %vm291_vm0, %v272_v35 }
  0x76   : > { %1713 = vmatmul.mubr.msk.f32.gmra.mrb[46].mxu0 %vm291_vm0, %v219_v36  ;;  %1794 = vmatmul.mubr.msk.f32.gmra.mrb[46].mxu1 %vm291_vm0, %v273_v37 }
  0x77   : > { %1715 = vmatprep.mubr.msk.f32.mxu0 %vm291_vm0, %v220_v38  ;;  %1796 = vmatprep.mubr.msk.f32.mxu1 %vm291_vm0, %v274_v39 }
  0x7a   : > { %1716 = vmatmul.mubr.msk.f32.gmra.mrb[48].mxu0 %vm291_vm0, %v221_v40  ;;  %1797 = vmatmul.mubr.msk.f32.gmra.mrb[48].mxu1 %vm291_vm0, %v275_v41 }
  0x7b   : > { %1718 = vmatprep.mubr.msk.f32.mxu0 %vm291_vm0, %v222_v42  ;;  %1799 = vmatprep.mubr.msk.f32.mxu1 %vm291_vm0, %v276_v43 }
  0x7e   : > { %1719 = vmatmul.mubr.msk.f32.gmra.mrb[50].mxu0 %vm291_vm0, %v223_v44  ;;  %1800 = vmatmul.mubr.msk.f32.gmra.mrb[50].mxu1 %vm291_vm0, %v277_v45 }
  0x7f   : > { %1721 = vmatprep.mubr.msk.f32.mxu0 %vm291_vm0, %v224_v46  ;;  %1802 = vmatprep.mubr.msk.f32.mxu1 %vm291_vm0, %v278_v47 }
  0x82   : > { %1722 = vmatmul.mubr.msk.f32.gmra.mrb[52].mxu0 %vm291_vm0, %v225_v48  ;;  %1803 = vmatmul.mubr.msk.f32.gmra.mrb[52].mxu1 %vm291_vm0, %v279_v49 }
  0xed   : > { %v1645_v51 = vpop.f32.mrb[0].mxu0  ;;  %v1726_v52 = vpop.f32.mrb[0].mxu1 }
  0xee   : > { %v688_v53 = vadd.f32 %v1645_v51, %v2234_v50  ;;  %v958_v54 = vadd.f32 %v1726_v52, %v2234_v50  ;;  %v682_v55 = vpop.f32.mrb[1].mxu0  ;;  %v952_v56 = vpop.f32.mrb[1].mxu1 }
  0xef   : > { %v683_v57 = vadd.f32 %v2234_v50, %v682_v55  ;;  %v953_v58 = vadd.f32 %v2234_v50, %v952_v56 }
  0xf0   : > { %1222 = vst [vmem:[%s2240_s20 + $0x8] sm:$0xff] %v688_v53  ;;  %1276 = vst [vmem:[%s2240_s20 + $0x1b8] sm:$0xff] %v958_v54 }
  0xf1   : > { %1221 = vst [vmem:[%s2240_s20] sm:$0xff] %v683_v57  ;;  %1275 = vst [vmem:[%s2240_s20 + $0x1b0] sm:$0xff] %v953_v58  ;;  %v1648_v59 = vpop.f32.mrb[2].mxu0  ;;  %v1729_v60 = vpop.f32.mrb[2].mxu1 }
  0xf2   : > { %v698_v61 = vadd.f32 %v1648_v59, %v2234_v50  ;;  %v968_v62 = vadd.f32 %v1729_v60, %v2234_v50  ;;  %v692_v63 = vpop.f32.mrb[3].mxu0  ;;  %v962_v0 = vpop.f32.mrb[3].mxu1 }
  0xf3   : > { %v693_v1 = vadd.f32 %v2234_v50, %v692_v63  ;;  %v963_v2 = vadd.f32 %v2234_v50, %v962_v0 }
  0xf4   : > { %1224 = vst [vmem:[%s2240_s20 + $0x18] sm:$0xff] %v698_v61  ;;  %1278 = vst [vmem:[%s2240_s20 + $0x1c8] sm:$0xff] %v968_v62 }
  0xf5   : > { %1223 = vst [vmem:[%s2240_s20 + $0x10] sm:$0xff] %v693_v1  ;;  %1277 = vst [vmem:[%s2240_s20 + $0x1c0] sm:$0xff] %v963_v2  ;;  %v1651_v3 = vpop.f32.mrb[4].mxu0  ;;  %v1732_v4 = vpop.f32.mrb[4].mxu1 }
  0xf6   : > { %v708_v5 = vadd.f32 %v1651_v3, %v2234_v50  ;;  %v978_v6 = vadd.f32 %v1732_v4, %v2234_v50  ;;  %v702_v7 = vpop.f32.mrb[5].mxu0  ;;  %v972_v8 = vpop.f32.mrb[5].mxu1 }
  0xf7   : > { %v703_v9 = vadd.f32 %v2234_v50, %v702_v7  ;;  %v973_v10 = vadd.f32 %v2234_v50, %v972_v8 }
  0xf8   : > { %1226 = vst [vmem:[%s2240_s20 + $0x28] sm:$0xff] %v708_v5  ;;  %1280 = vst [vmem:[%s2240_s20 + $0x1d8] sm:$0xff] %v978_v6 }
  0xf9   : > { %1225 = vst [vmem:[%s2240_s20 + $0x20] sm:$0xff] %v703_v9  ;;  %1279 = vst [vmem:[%s2240_s20 + $0x1d0] sm:$0xff] %v973_v10  ;;  %v1654_v11 = vpop.f32.mrb[6].mxu0  ;;  %v1735_v12 = vpop.f32.mrb[6].mxu1 }
  0xfa   : > { %v718_v13 = vadd.f32 %v1654_v11, %v2234_v50  ;;  %v988_v14 = vadd.f32 %v1735_v12, %v2234_v50  ;;  %v712_v15 = vpop.f32.mrb[7].mxu0  ;;  %v982_v16 = vpop.f32.mrb[7].mxu1 }
  0xfb   : > { %v713_v17 = vadd.f32 %v2234_v50, %v712_v15  ;;  %v983_v18 = vadd.f32 %v2234_v50, %v982_v16 }
  0xfc   : > { %1228 = vst [vmem:[%s2240_s20 + $0x38] sm:$0xff] %v718_v13  ;;  %1282 = vst [vmem:[%s2240_s20 + $0x1e8] sm:$0xff] %v988_v14 }
  0xfd   : > { %1227 = vst [vmem:[%s2240_s20 + $0x30] sm:$0xff] %v713_v17  ;;  %1281 = vst [vmem:[%s2240_s20 + $0x1e0] sm:$0xff] %v983_v18  ;;  %v1657_v19 = vpop.f32.mrb[8].mxu0  ;;  %v1738_v20 = vpop.f32.mrb[8].mxu1 }
  0xfe   : > { %v728_v21 = vadd.f32 %v1657_v19, %v2234_v50  ;;  %v998_v22 = vadd.f32 %v1738_v20, %v2234_v50  ;;  %v722_v23 = vpop.f32.mrb[9].mxu0  ;;  %v992_v24 = vpop.f32.mrb[9].mxu1 }
  0xff   : > { %v723_v25 = vadd.f32 %v2234_v50, %v722_v23  ;;  %v993_v26 = vadd.f32 %v2234_v50, %v992_v24 }
 0x100   : > { %1230 = vst [vmem:[%s2240_s20 + $0x48] sm:$0xff] %v728_v21  ;;  %1284 = vst [vmem:[%s2240_s20 + $0x1f8] sm:$0xff] %v998_v22 }
 0x101   : > { %1229 = vst [vmem:[%s2240_s20 + $0x40] sm:$0xff] %v723_v25  ;;  %1283 = vst [vmem:[%s2240_s20 + $0x1f0] sm:$0xff] %v993_v26  ;;  %v1660_v27 = vpop.f32.mrb[10].mxu0  ;;  %v1741_v28 = vpop.f32.mrb[10].mxu1 }
 0x102   : > { %v738_v29 = vadd.f32 %v1660_v27, %v2234_v50  ;;  %v1008_v30 = vadd.f32 %v1741_v28, %v2234_v50  ;;  %v732_v31 = vpop.f32.mrb[11].mxu0  ;;  %v1002_v32 = vpop.f32.mrb[11].mxu1 }
 0x103   : > { %v733_v33 = vadd.f32 %v2234_v50, %v732_v31  ;;  %v1003_v34 = vadd.f32 %v2234_v50, %v1002_v32 }
 0x104   : > { %1232 = vst [vmem:[%s2240_s20 + $0x58] sm:$0xff] %v738_v29  ;;  %1286 = vst [vmem:[%s2240_s20 + $0x208] sm:$0xff] %v1008_v30 }
 0x105   : > { %1231 = vst [vmem:[%s2240_s20 + $0x50] sm:$0xff] %v733_v33  ;;  %1285 = vst [vmem:[%s2240_s20 + $0x200] sm:$0xff] %v1003_v34  ;;  %v1663_v35 = vpop.f32.mrb[12].mxu0  ;;  %v1744_v36 = vpop.f32.mrb[12].mxu1 }
 0x106   : > { %v748_v37 = vadd.f32 %v1663_v35, %v2234_v50  ;;  %v1018_v38 = vadd.f32 %v1744_v36, %v2234_v50  ;;  %v742_v39 = vpop.f32.mrb[13].mxu0  ;;  %v1012_v40 = vpop.f32.mrb[13].mxu1 }
 0x107   : > { %v743_v41 = vadd.f32 %v2234_v50, %v742_v39  ;;  %v1013_v42 = vadd.f32 %v2234_v50, %v1012_v40 }
 0x108   : > { %1234 = vst [vmem:[%s2240_s20 + $0x68] sm:$0xff] %v748_v37  ;;  %1288 = vst [vmem:[%s2240_s20 + $0x218] sm:$0xff] %v1018_v38 }
 0x109   : > { %1233 = vst [vmem:[%s2240_s20 + $0x60] sm:$0xff] %v743_v41  ;;  %1287 = vst [vmem:[%s2240_s20 + $0x210] sm:$0xff] %v1013_v42  ;;  %v1666_v43 = vpop.f32.mrb[14].mxu0  ;;  %v1747_v44 = vpop.f32.mrb[14].mxu1 }
 0x10a   : > { %v758_v45 = vadd.f32 %v1666_v43, %v2234_v50  ;;  %v1028_v46 = vadd.f32 %v1747_v44, %v2234_v50  ;;  %v752_v47 = vpop.f32.mrb[15].mxu0  ;;  %v1022_v48 = vpop.f32.mrb[15].mxu1 }
 0x10b   : > { %v753_v49 = vadd.f32 %v2234_v50, %v752_v47  ;;  %v1023_v51 = vadd.f32 %v2234_v50, %v1022_v48 }
 0x10c   : > { %1236 = vst [vmem:[%s2240_s20 + $0x78] sm:$0xff] %v758_v45  ;;  %1290 = vst [vmem:[%s2240_s20 + $0x228] sm:$0xff] %v1028_v46 }
 0x10d   : > { %1235 = vst [vmem:[%s2240_s20 + $0x70] sm:$0xff] %v753_v49  ;;  %1289 = vst [vmem:[%s2240_s20 + $0x220] sm:$0xff] %v1023_v51  ;;  %v1669_v52 = vpop.f32.mrb[16].mxu0  ;;  %v1750_v53 = vpop.f32.mrb[16].mxu1 }
 0x10e   : > { %v768_v54 = vadd.f32 %v1669_v52, %v2234_v50  ;;  %v1038_v55 = vadd.f32 %v1750_v53, %v2234_v50  ;;  %v762_v56 = vpop.f32.mrb[17].mxu0  ;;  %v1032_v57 = vpop.f32.mrb[17].mxu1 }
 0x10f   : > { %v763_v58 = vadd.f32 %v2234_v50, %v762_v56  ;;  %v1033_v59 = vadd.f32 %v2234_v50, %v1032_v57 }
 0x110   : > { %1238 = vst [vmem:[%s2240_s20 + $0x88] sm:$0xff] %v768_v54  ;;  %1292 = vst [vmem:[%s2240_s20 + $0x238] sm:$0xff] %v1038_v55 }
 0x111   : > { %1237 = vst [vmem:[%s2240_s20 + $0x80] sm:$0xff] %v763_v58  ;;  %1291 = vst [vmem:[%s2240_s20 + $0x230] sm:$0xff] %v1033_v59  ;;  %v1672_v60 = vpop.f32.mrb[18].mxu0  ;;  %v1753_v61 = vpop.f32.mrb[18].mxu1 }
 0x112   : > { %v778_v62 = vadd.f32 %v1672_v60, %v2234_v50  ;;  %v1048_v63 = vadd.f32 %v1753_v61, %v2234_v50  ;;  %v772_v0 = vpop.f32.mrb[19].mxu0  ;;  %v1042_v1 = vpop.f32.mrb[19].mxu1 }
 0x113   : > { %v773_v2 = vadd.f32 %v2234_v50, %v772_v0  ;;  %v1043_v3 = vadd.f32 %v2234_v50, %v1042_v1 }
 0x114   : > { %1240 = vst [vmem:[%s2240_s20 + $0x98] sm:$0xff] %v778_v62  ;;  %1294 = vst [vmem:[%s2240_s20 + $0x248] sm:$0xff] %v1048_v63 }
 0x115   : > { %1239 = vst [vmem:[%s2240_s20 + $0x90] sm:$0xff] %v773_v2  ;;  %1293 = vst [vmem:[%s2240_s20 + $0x240] sm:$0xff] %v1043_v3  ;;  %v1675_v4 = vpop.f32.mrb[20].mxu0  ;;  %v1756_v5 = vpop.f32.mrb[20].mxu1 }
 0x116   : > { %v788_v6 = vadd.f32 %v1675_v4, %v2234_v50  ;;  %v1058_v7 = vadd.f32 %v1756_v5, %v2234_v50  ;;  %v782_v8 = vpop.f32.mrb[21].mxu0  ;;  %v1052_v9 = vpop.f32.mrb[21].mxu1 }
 0x117   : > { %v783_v10 = vadd.f32 %v2234_v50, %v782_v8  ;;  %v1053_v11 = vadd.f32 %v2234_v50, %v1052_v9 }
 0x118   : > { %1242 = vst [vmem:[%s2240_s20 + $0xa8] sm:$0xff] %v788_v6  ;;  %1296 = vst [vmem:[%s2240_s20 + $0x258] sm:$0xff] %v1058_v7 }
 0x119   : > { %1241 = vst [vmem:[%s2240_s20 + $0xa0] sm:$0xff] %v783_v10  ;;  %1295 = vst [vmem:[%s2240_s20 + $0x250] sm:$0xff] %v1053_v11  ;;  %v1678_v12 = vpop.f32.mrb[22].mxu0  ;;  %v1759_v13 = vpop.f32.mrb[22].mxu1 }
 0x11a   : > { %v798_v14 = vadd.f32 %v1678_v12, %v2234_v50  ;;  %v1068_v15 = vadd.f32 %v1759_v13, %v2234_v50  ;;  %v792_v16 = vpop.f32.mrb[23].mxu0  ;;  %v1062_v17 = vpop.f32.mrb[23].mxu1 }
 0x11b   : > { %v793_v18 = vadd.f32 %v2234_v50, %v792_v16  ;;  %v1063_v19 = vadd.f32 %v2234_v50, %v1062_v17 }
 0x11c   : > { %1244 = vst [vmem:[%s2240_s20 + $0xb8] sm:$0xff] %v798_v14  ;;  %1298 = vst [vmem:[%s2240_s20 + $0x268] sm:$0xff] %v1068_v15 }
 0x11d   : > { %1243 = vst [vmem:[%s2240_s20 + $0xb0] sm:$0xff] %v793_v18  ;;  %1297 = vst [vmem:[%s2240_s20 + $0x260] sm:$0xff] %v1063_v19  ;;  %v1681_v20 = vpop.f32.mrb[24].mxu0  ;;  %v1762_v21 = vpop.f32.mrb[24].mxu1 }
 0x11e   : > { %v808_v22 = vadd.f32 %v1681_v20, %v2234_v50  ;;  %v1078_v23 = vadd.f32 %v1762_v21, %v2234_v50  ;;  %v802_v24 = vpop.f32.mrb[25].mxu0  ;;  %v1072_v25 = vpop.f32.mrb[25].mxu1 }
 0x11f   : > { %v803_v26 = vadd.f32 %v2234_v50, %v802_v24  ;;  %v1073_v27 = vadd.f32 %v2234_v50, %v1072_v25 }
 0x120   : > { %1246 = vst [vmem:[%s2240_s20 + $0xc8] sm:$0xff] %v808_v22  ;;  %1300 = vst [vmem:[%s2240_s20 + $0x278] sm:$0xff] %v1078_v23 }
 0x121   : > { %1245 = vst [vmem:[%s2240_s20 + $0xc0] sm:$0xff] %v803_v26  ;;  %1299 = vst [vmem:[%s2240_s20 + $0x270] sm:$0xff] %v1073_v27  ;;  %v1684_v28 = vpop.f32.mrb[26].mxu0  ;;  %v1765_v29 = vpop.f32.mrb[26].mxu1 }
 0x122   : > { %v818_v30 = vadd.f32 %v1684_v28, %v2234_v50  ;;  %v1088_v31 = vadd.f32 %v1765_v29, %v2234_v50  ;;  %v812_v32 = vpop.f32.mrb[27].mxu0  ;;  %v1082_v33 = vpop.f32.mrb[27].mxu1 }
 0x123   : > { %v813_v34 = vadd.f32 %v2234_v50, %v812_v32  ;;  %v1083_v35 = vadd.f32 %v2234_v50, %v1082_v33 }
 0x124   : > { %1248 = vst [vmem:[%s2240_s20 + $0xd8] sm:$0xff] %v818_v30  ;;  %1302 = vst [vmem:[%s2240_s20 + $0x288] sm:$0xff] %v1088_v31 }
 0x125   : > { %1247 = vst [vmem:[%s2240_s20 + $0xd0] sm:$0xff] %v813_v34  ;;  %1301 = vst [vmem:[%s2240_s20 + $0x280] sm:$0xff] %v1083_v35  ;;  %v1687_v36 = vpop.f32.mrb[28].mxu0  ;;  %v1768_v37 = vpop.f32.mrb[28].mxu1 }
 0x126   : > { %v828_v38 = vadd.f32 %v1687_v36, %v2234_v50  ;;  %v1098_v39 = vadd.f32 %v1768_v37, %v2234_v50  ;;  %v822_v40 = vpop.f32.mrb[29].mxu0  ;;  %v1092_v41 = vpop.f32.mrb[29].mxu1 }
 0x127   : > { %v823_v42 = vadd.f32 %v2234_v50, %v822_v40  ;;  %v1093_v43 = vadd.f32 %v2234_v50, %v1092_v41 }
 0x128   : > { %1250 = vst [vmem:[%s2240_s20 + $0xe8] sm:$0xff] %v828_v38  ;;  %1304 = vst [vmem:[%s2240_s20 + $0x298] sm:$0xff] %v1098_v39 }
 0x129   : > { %1249 = vst [vmem:[%s2240_s20 + $0xe0] sm:$0xff] %v823_v42  ;;  %1303 = vst [vmem:[%s2240_s20 + $0x290] sm:$0xff] %v1093_v43  ;;  %v1690_v44 = vpop.f32.mrb[30].mxu0  ;;  %v1771_v45 = vpop.f32.mrb[30].mxu1 }
 0x12a   : > { %v838_v46 = vadd.f32 %v1690_v44, %v2234_v50  ;;  %v1108_v47 = vadd.f32 %v1771_v45, %v2234_v50  ;;  %v832_v48 = vpop.f32.mrb[31].mxu0  ;;  %v1102_v49 = vpop.f32.mrb[31].mxu1 }
 0x12b   : > { %v833_v51 = vadd.f32 %v2234_v50, %v832_v48  ;;  %v1103_v52 = vadd.f32 %v2234_v50, %v1102_v49 }
 0x12c   : > { %1252 = vst [vmem:[%s2240_s20 + $0xf8] sm:$0xff] %v838_v46  ;;  %1306 = vst [vmem:[%s2240_s20 + $0x2a8] sm:$0xff] %v1108_v47 }
 0x12d   : > { %1251 = vst [vmem:[%s2240_s20 + $0xf0] sm:$0xff] %v833_v51  ;;  %1305 = vst [vmem:[%s2240_s20 + $0x2a0] sm:$0xff] %v1103_v52  ;;  %v1693_v53 = vpop.f32.mrb[32].mxu0  ;;  %v1774_v54 = vpop.f32.mrb[32].mxu1 }
 0x12e   : > { %v848_v55 = vadd.f32 %v1693_v53, %v2234_v50  ;;  %v1118_v56 = vadd.f32 %v1774_v54, %v2234_v50  ;;  %v842_v57 = vpop.f32.mrb[33].mxu0  ;;  %v1112_v58 = vpop.f32.mrb[33].mxu1 }
 0x12f   : > { %v843_v59 = vadd.f32 %v2234_v50, %v842_v57  ;;  %v1113_v60 = vadd.f32 %v2234_v50, %v1112_v58 }
 0x130   : > { %1254 = vst [vmem:[%s2240_s20 + $0x108] sm:$0xff] %v848_v55  ;;  %1308 = vst [vmem:[%s2240_s20 + $0x2b8] sm:$0xff] %v1118_v56 }
 0x131   : > { %1253 = vst [vmem:[%s2240_s20 + $0x100] sm:$0xff] %v843_v59  ;;  %1307 = vst [vmem:[%s2240_s20 + $0x2b0] sm:$0xff] %v1113_v60  ;;  %v1696_v61 = vpop.f32.mrb[34].mxu0  ;;  %v1777_v62 = vpop.f32.mrb[34].mxu1 }
 0x132   : > { %v858_v63 = vadd.f32 %v1696_v61, %v2234_v50  ;;  %v1128_v0 = vadd.f32 %v1777_v62, %v2234_v50  ;;  %v852_v1 = vpop.f32.mrb[35].mxu0  ;;  %v1122_v2 = vpop.f32.mrb[35].mxu1 }
 0x133   : > { %v853_v3 = vadd.f32 %v2234_v50, %v852_v1  ;;  %v1123_v4 = vadd.f32 %v2234_v50, %v1122_v2 }
 0x134   : > { %1256 = vst [vmem:[%s2240_s20 + $0x118] sm:$0xff] %v858_v63  ;;  %1310 = vst [vmem:[%s2240_s20 + $0x2c8] sm:$0xff] %v1128_v0 }
 0x135   : > { %1255 = vst [vmem:[%s2240_s20 + $0x110] sm:$0xff] %v853_v3  ;;  %1309 = vst [vmem:[%s2240_s20 + $0x2c0] sm:$0xff] %v1123_v4  ;;  %v1699_v5 = vpop.f32.mrb[36].mxu0  ;;  %v1780_v6 = vpop.f32.mrb[36].mxu1 }
 0x136   : > { %v868_v7 = vadd.f32 %v1699_v5, %v2234_v50  ;;  %v1138_v8 = vadd.f32 %v1780_v6, %v2234_v50  ;;  %v862_v9 = vpop.f32.mrb[37].mxu0  ;;  %v1132_v10 = vpop.f32.mrb[37].mxu1 }
 0x137   : > { %v863_v11 = vadd.f32 %v2234_v50, %v862_v9  ;;  %v1133_v12 = vadd.f32 %v2234_v50, %v1132_v10 }
 0x138   : > { %1258 = vst [vmem:[%s2240_s20 + $0x128] sm:$0xff] %v868_v7  ;;  %1312 = vst [vmem:[%s2240_s20 + $0x2d8] sm:$0xff] %v1138_v8 }
 0x139   : > { %1257 = vst [vmem:[%s2240_s20 + $0x120] sm:$0xff] %v863_v11  ;;  %1311 = vst [vmem:[%s2240_s20 + $0x2d0] sm:$0xff] %v1133_v12  ;;  %v1702_v13 = vpop.f32.mrb[38].mxu0  ;;  %v1783_v14 = vpop.f32.mrb[38].mxu1 }
 0x13a   : > { %v878_v15 = vadd.f32 %v1702_v13, %v2234_v50  ;;  %v1148_v16 = vadd.f32 %v1783_v14, %v2234_v50  ;;  %v872_v17 = vpop.f32.mrb[39].mxu0  ;;  %v1142_v18 = vpop.f32.mrb[39].mxu1 }
 0x13b   : > { %v873_v19 = vadd.f32 %v2234_v50, %v872_v17  ;;  %v1143_v20 = vadd.f32 %v2234_v50, %v1142_v18 }
 0x13c   : > { %1260 = vst [vmem:[%s2240_s20 + $0x138] sm:$0xff] %v878_v15  ;;  %1314 = vst [vmem:[%s2240_s20 + $0x2e8] sm:$0xff] %v1148_v16 }
 0x13d   : > { %1259 = vst [vmem:[%s2240_s20 + $0x130] sm:$0xff] %v873_v19  ;;  %1313 = vst [vmem:[%s2240_s20 + $0x2e0] sm:$0xff] %v1143_v20  ;;  %v1705_v21 = vpop.f32.mrb[40].mxu0  ;;  %v1786_v22 = vpop.f32.mrb[40].mxu1 }
 0x13e   : > { %v888_v23 = vadd.f32 %v1705_v21, %v2234_v50  ;;  %v1158_v24 = vadd.f32 %v1786_v22, %v2234_v50  ;;  %v882_v25 = vpop.f32.mrb[41].mxu0  ;;  %v1152_v26 = vpop.f32.mrb[41].mxu1 }
 0x13f   : > { %v883_v27 = vadd.f32 %v2234_v50, %v882_v25  ;;  %v1153_v28 = vadd.f32 %v2234_v50, %v1152_v26 }
 0x140   : > { %1262 = vst [vmem:[%s2240_s20 + $0x148] sm:$0xff] %v888_v23  ;;  %1316 = vst [vmem:[%s2240_s20 + $0x2f8] sm:$0xff] %v1158_v24 }
 0x141   : > { %1261 = vst [vmem:[%s2240_s20 + $0x140] sm:$0xff] %v883_v27  ;;  %1315 = vst [vmem:[%s2240_s20 + $0x2f0] sm:$0xff] %v1153_v28  ;;  %v1708_v29 = vpop.f32.mrb[42].mxu0  ;;  %v1789_v30 = vpop.f32.mrb[42].mxu1 }
 0x142   : > { %v898_v31 = vadd.f32 %v1708_v29, %v2234_v50  ;;  %v1168_v32 = vadd.f32 %v1789_v30, %v2234_v50  ;;  %v892_v33 = vpop.f32.mrb[43].mxu0  ;;  %v1162_v34 = vpop.f32.mrb[43].mxu1 }
 0x143   : > { %v893_v35 = vadd.f32 %v2234_v50, %v892_v33  ;;  %v1163_v36 = vadd.f32 %v2234_v50, %v1162_v34 }
 0x144   : > { %1264 = vst [vmem:[%s2240_s20 + $0x158] sm:$0xff] %v898_v31  ;;  %1318 = vst [vmem:[%s2240_s20 + $0x308] sm:$0xff] %v1168_v32 }
 0x145   : > { %1263 = vst [vmem:[%s2240_s20 + $0x150] sm:$0xff] %v893_v35  ;;  %1317 = vst [vmem:[%s2240_s20 + $0x300] sm:$0xff] %v1163_v36  ;;  %v1711_v37 = vpop.f32.mrb[44].mxu0  ;;  %v1792_v38 = vpop.f32.mrb[44].mxu1 }
 0x146   : > { %v908_v39 = vadd.f32 %v1711_v37, %v2234_v50  ;;  %v1178_v40 = vadd.f32 %v1792_v38, %v2234_v50  ;;  %v902_v41 = vpop.f32.mrb[45].mxu0  ;;  %v1172_v42 = vpop.f32.mrb[45].mxu1 }
 0x147   : > { %v903_v43 = vadd.f32 %v2234_v50, %v902_v41  ;;  %v1173_v44 = vadd.f32 %v2234_v50, %v1172_v42 }
 0x148   : > { %1266 = vst [vmem:[%s2240_s20 + $0x168] sm:$0xff] %v908_v39  ;;  %1320 = vst [vmem:[%s2240_s20 + $0x318] sm:$0xff] %v1178_v40 }
 0x149   : > { %1265 = vst [vmem:[%s2240_s20 + $0x160] sm:$0xff] %v903_v43  ;;  %1319 = vst [vmem:[%s2240_s20 + $0x310] sm:$0xff] %v1173_v44  ;;  %v1714_v45 = vpop.f32.mrb[46].mxu0  ;;  %v1795_v46 = vpop.f32.mrb[46].mxu1 }
 0x14a   : > { %v918_v47 = vadd.f32 %v1714_v45, %v2234_v50  ;;  %v1188_v48 = vadd.f32 %v1795_v46, %v2234_v50  ;;  %v912_v49 = vpop.f32.mrb[47].mxu0  ;;  %v1182_v51 = vpop.f32.mrb[47].mxu1 }
 0x14b   : > { %v913_v52 = vadd.f32 %v2234_v50, %v912_v49  ;;  %v1183_v53 = vadd.f32 %v2234_v50, %v1182_v51 }
 0x14c   : > { %1268 = vst [vmem:[%s2240_s20 + $0x178] sm:$0xff] %v918_v47  ;;  %1322 = vst [vmem:[%s2240_s20 + $0x328] sm:$0xff] %v1188_v48 }
 0x14d   : > { %1267 = vst [vmem:[%s2240_s20 + $0x170] sm:$0xff] %v913_v52  ;;  %1321 = vst [vmem:[%s2240_s20 + $0x320] sm:$0xff] %v1183_v53  ;;  %v1717_v54 = vpop.f32.mrb[48].mxu0  ;;  %v1798_v55 = vpop.f32.mrb[48].mxu1 }
 0x14e   : > { %v928_v56 = vadd.f32 %v1717_v54, %v2234_v50  ;;  %v1198_v57 = vadd.f32 %v1798_v55, %v2234_v50  ;;  %v922_v58 = vpop.f32.mrb[49].mxu0  ;;  %v1192_v59 = vpop.f32.mrb[49].mxu1 }
 0x14f   : > { %v923_v60 = vadd.f32 %v2234_v50, %v922_v58  ;;  %v1193_v61 = vadd.f32 %v2234_v50, %v1192_v59 }
 0x150   : > { %1270 = vst [vmem:[%s2240_s20 + $0x188] sm:$0xff] %v928_v56  ;;  %1324 = vst [vmem:[%s2240_s20 + $0x338] sm:$0xff] %v1198_v57 }
 0x151   : > { %1269 = vst [vmem:[%s2240_s20 + $0x180] sm:$0xff] %v923_v60  ;;  %1323 = vst [vmem:[%s2240_s20 + $0x330] sm:$0xff] %v1193_v61  ;;  %v1720_v62 = vpop.f32.mrb[50].mxu0  ;;  %v1801_v63 = vpop.f32.mrb[50].mxu1 }
 0x152   : > { %v938_v0 = vadd.f32 %v1720_v62, %v2234_v50  ;;  %v1208_v1 = vadd.f32 %v1801_v63, %v2234_v50  ;;  %v932_v2 = vpop.f32.mrb[51].mxu0  ;;  %v1202_v3 = vpop.f32.mrb[51].mxu1 }
 0x153   : > { %v933_v4 = vadd.f32 %v2234_v50, %v932_v2  ;;  %v1203_v5 = vadd.f32 %v2234_v50, %v1202_v3 }
 0x154   : > { %1272 = vst [vmem:[%s2240_s20 + $0x198] sm:$0xff] %v938_v0  ;;  %1326 = vst [vmem:[%s2240_s20 + $0x348] sm:$0xff] %v1208_v1 }
 0x155   : > { %1271 = vst [vmem:[%s2240_s20 + $0x190] sm:$0xff] %v933_v4  ;;  %1325 = vst [vmem:[%s2240_s20 + $0x340] sm:$0xff] %v1203_v5  ;;  %v1723_v6 = vpop.f32.mrb[52].mxu0  ;;  %v1804_v7 = vpop.f32.mrb[52].mxu1 }
 0x156   : > { %v948_v8 = vadd.f32 %v1723_v6, %v2234_v50  ;;  %v1218_v9 = vadd.f32 %v1804_v7, %v2234_v50  ;;  %v942_v10 = vpop.f32.mrb[53].mxu0  ;;  %v1212_v11 = vpop.f32.mrb[53].mxu1 }
 0x157   : > { %v943_v12 = vadd.f32 %v2234_v50, %v942_v10  ;;  %v1213_v13 = vadd.f32 %v2234_v50, %v1212_v11 }
 0x158   : > { %1274 = vst [vmem:[%s2240_s20 + $0x1a8] sm:$0xff] %v948_v8  ;;  %1328 = vst [vmem:[%s2240_s20 + $0x358] sm:$0xff] %v1218_v9 }
 0x159   : > { %1273 = vst [vmem:[%s2240_s20 + $0x1a0] sm:$0xff] %v943_v12  ;;  %1327 = vst [vmem:[%s2240_s20 + $0x350] sm:$0xff] %v1213_v13 }
 0x15a   : > { %1872 = shalt.err (!%p1869_p3)
}
 0x15b   : > { %s1873_s6 = scalar_lea.hbm %s2453_s27, 13824  ;;  %s1877_s9 = scalar_lea.hbm %s2509_s3, 27648 }
 0x15c   : > { %p1874_p4 = scmp.ne.s32.totalorder %s2453_s27, %s1873_s6  ;;  %p1878_p9 = scmp.lt.u32.totalorder %s2453_s27, %s2509_s3 }
 0x15d   : > { %p1879_p10 = scmp.lt.u32.totalorder %s1877_s9, %s1873_s6  ;;  %p1881_p12 = scmp.lt.u32.totalorder %s1873_s6, %s2453_s27 }
 0x15e   : > { %p1875_p7 = pnand %p1874_p4, %p1984_p5 }
 0x15f   : > { %p1880_p11 = por %p1879_p10, %p1878_p9 }
 0x160   : > { %p1876_p8 = pneg %p1875_p7 }
 0x161   : > { %p1882_p13 = por %p1881_p12, %p1880_p11 }
 0x163   : > { %p1883_p0 = pnand %p1882_p13, %p1876_p8 }
 0x165   : > { %1886 = shalt.err (!%p1883_p0)
}
 0x166   : > { %s1924_s17 = smov 128   ;;  %s1925_s19 = smov 8  }
 0x167   : > { %1818 = dma.vmem_to_hbm [thread:$0]  (%p1984_p5), %s2455_s25, 13824, %s2453_s27, %s2465_s28, %s1924_s17, %s1924_s17, %s1925_s19  }
 0x168 PF: > { %p1824_p1 = scmp.ge.s32.totalorder %s1921_s15, 2  ;;  %s1358_s20 = sand.u32 1, %s1909_s12  }
 0x169   : > { %s1359_s24 = scalar_lea.sflag [#allocation3], %s1358_s20 }
 0x16a   : > { %p1821_p2 = pnand %p1824_p1, %p1988_p6 }
 0x16c   : > { %1904 = dma.done.wait (!%p1821_p2), %s1359_s24, 13824  }
 0x16d   : > { %1906 = vsyncadd (!%p1821_p2), %s1359_s24, 4294953472  ;;  %p13_p3 = scmp.ge.s32.totalorder %s1971_s18, 4   ;;  %s2512_s12 = smov %s1913_s13 }
 0x16e   : > { %s2513_s13 = smov %s1917_s14  ;;  %s2514_s14 = smov %s1982_s21 }
 0x16f   : > { %s2515_s15 = smov %s1971_s18  ;;  %15 = sbr.rel (!%p13_p3) target bundleno = 3 (0x3), region = 67 }
 0x176   :  { %1364 = vsyncpa [#allocation3], 1 }
 0x177   :  { %1366 = vsyncpa [#allocation3 + $0x1], 1 }

</bundles_post_ra>
